<compile_context>
chip_gen: v5e
topology: v5e:2x2
jax: 0.10.0
libtpu: 0.0.40
codegen_flags: <defaults>
</compile_context>

<pallas_src>
import functools

import jax
import jax.numpy as jnp
from jax import lax
from jax.experimental import pallas as pl
from jax.experimental.pallas import tpu as pltpu


def _pool_kernel(x_ref, o_ref, acc_ref, *, mode, inv_n, seq_len, tile_l,
                 ragged, fill):
    """One (tile_b, tile_l, tile_d) slab of the pooled axis.

    Grid = (batch blocks, feature blocks, reduction blocks); reduction last.
    x_ref:   (tile_b, tile_l, tile_d)   input tile
    o_ref:   (tile_b, tile_d)           output (same block for every k step)
    acc_ref: (tile_b, fold_rows, tile_d) resident accumulator scratch
    """
    k = pl.program_id(2)                      # reduction axis is last
    tb, tl, d = x_ref.shape

    x = x_ref[...]
    if mode == "mean":
        x = x.astype(jnp.float32)             # accumulate mean in f32

    if ragged:
        # The last reduction block overruns L; out-of-bounds rows hold
        # unspecified values -> neutralize them with the reduction identity.
        row = lax.broadcasted_iota(jnp.int32, (1, tl, 1), 1)
        valid = (k * tile_l + row) < seq_len
        x = jnp.where(valid, x, jnp.asarray(fill, dtype=x.dtype))

    # Fold the pooled axis down to one sublane-group (8 rows) with an
    # element-wise reduce across vregs (VALU only); defer the single
    # cross-sublane (XLU) reduce to the epilogue.
    if tl % 8 == 0:
        xg = x.reshape(tb, tl // 8, 8, d)
        if mode == "max":
            partial = jnp.max(xg, axis=1)     # (tb, 8, d)
        else:
            partial = jnp.sum(xg, axis=1)     # (tb, 8, d), f32
    else:
        # Tiny L (< 8): single full-extent block, reduce directly.
        if mode == "max":
            partial = jnp.max(x, axis=1, keepdims=True)   # (tb, 1, d)
        else:
            partial = jnp.sum(x, axis=1, keepdims=True)   # (tb, 1, d)

    @pl.when(k == 0)
    def _():
        acc_ref[...] = partial

    @pl.when(k > 0)
    def _():
        if mode == "max":
            acc_ref[...] = jnp.maximum(acc_ref[...], partial)
        else:
            acc_ref[...] = acc_ref[...] + partial

    @pl.when(k == pl.num_programs(2) - 1)
    def _():
        acc = acc_ref[...]
        if mode == "max":
            res = jnp.max(acc, axis=1)        # single cross-sublane reduce
        else:
            res = jnp.sum(acc, axis=1) * inv_n
        o_ref[...] = res.astype(o_ref.dtype)


def _round_up(x, m):
    return ((x + m - 1) // m) * m


def _vmem_capacity_bytes():
    try:
        return int(pltpu.get_tpu_info().vmem_capacity_bytes)
    except Exception:
        return 64 * 1024 * 1024   # conservative fallback: v7x per-TC VMEM


def global_pool(x, *, mode="max", _per_buffer_bytes=None):
    """Global pooling over axis 1 of a (B, L, D) array (pooled_axis=1)."""
    assert mode in ("max", "mean"), "Only max and mean-pooling are implemented"
    B, L, D = x.shape
    dt = x.dtype
    if mode == "mean":
        assert jnp.issubdtype(dt, jnp.floating), "mean-pooling needs a floating dtype"
    itemsize = jnp.dtype(dt).itemsize

    # ---------------- Tile sizing (no wrapper-side padding) ----------------
    vmem_cap = _vmem_capacity_bytes()
    vmem_limit = (vmem_cap * 3) // 4
    per_buffer = _per_buffer_bytes or min(16 << 20, (vmem_limit - (4 << 20)) // 2)

    # Small batch tile with long contiguous per-row slabs; B > 8 gives >=2
    # "parallel" batch blocks for megacore.
    tile_b = B if B <= 8 else 8
    grid_b = pl.cdiv(B, tile_b)

    # Feature tile: full D unless we need a second parallel block (small B)
    # or an 8-row slab would not fit the per-buffer budget (huge D).
    tile_d = D
    if grid_b < 2 and D >= 256:
        tile_d = _round_up(-(-D // 2), 128)
    while tile_d > 128 and 8 * tile_b * tile_d * itemsize > per_buffer:
        tile_d = _round_up(-(-tile_d // 2), 128)
    grid_d = pl.cdiv(D, tile_d)

    # Pooled-axis tile from the byte budget: big blocks -> long HBM bursts.
    max_tl = per_buffer // max(1, tile_b * tile_d * itemsize)
    max_tl = max(8, (max_tl // 8) * 8)
    if L < 8:
        tile_l = L                      # full-extent block for tiny L
    else:
        tile_l = min(max_tl, (L // 8) * 8)
    grid_l = pl.cdiv(L, tile_l)
    ragged = (L % tile_l) != 0
    fold_rows = 8 if (tile_l % 8 == 0) else 1

    if mode == "max":
        fill = -jnp.inf if jnp.issubdtype(dt, jnp.floating) else jnp.iinfo(dt).min
        acc_dtype = dt                  # exact max, half the vregs for bf16
    else:
        fill = 0.0
        acc_dtype = jnp.float32

    kernel = functools.partial(
        _pool_kernel, mode=mode, inv_n=1.0 / float(L), seq_len=L,
        tile_l=tile_l, ragged=ragged, fill=fill)

    cost = pl.CostEstimate(
        flops=B * L * D,
        transcendentals=0,
        bytes_accessed=B * L * D * itemsize + B * D * itemsize)

    return pl.pallas_call(
        kernel,
        out_shape=jax.ShapeDtypeStruct((B, D), dt),
        grid_spec=pltpu.PrefetchScalarGridSpec(
            num_scalar_prefetch=0,
            grid=(grid_b, grid_d, grid_l),          # reduction axis last
            in_specs=[pl.BlockSpec((tile_b, tile_l, tile_d),
                                   lambda b, d, k: (b, k, d))],
            out_specs=pl.BlockSpec((tile_b, tile_d), lambda b, d, k: (b, d)),
            scratch_shapes=[pltpu.VMEM((tile_b, fold_rows, tile_d), acc_dtype)],
        ),
        compiler_params=pltpu.CompilerParams(
            dimension_semantics=("parallel", "parallel", "arbitrary"),
            vmem_limit_bytes=vmem_limit,
        ),
        cost_estimate=cost,
    )(x)


if __name__ == "__main__":
    key = jax.random.PRNGKey(0)
    B, L, D = 2, 16, 128
    x = jax.random.normal(key, (B, L, D), dtype=jnp.float32)

    # Default GlobalPool(): pooled_axis=1, mode='max'
    out_max = jax.block_until_ready(global_pool(x, mode="max"))
    ref_max = jnp.max(x, axis=1)
    assert out_max.shape == (B, D)
    assert jnp.allclose(out_max, ref_max, atol=1e-6), "max-pool mismatch"

    # mode='mean'
    out_mean = jax.block_until_ready(global_pool(x, mode="mean"))
    ref_mean = jnp.mean(x, axis=1)
    assert jnp.allclose(out_mean, ref_mean, atol=1e-5), "mean-pool mismatch"

    # Non-aligned shapes: ragged pooled axis (masked last block) and D % 128 != 0.
    x2 = jax.random.normal(jax.random.PRNGKey(1), (3, 37, 96), dtype=jnp.float32)
    out2 = jax.block_until_ready(global_pool(x2, mode="max"))
    assert jnp.allclose(out2, jnp.max(x2, axis=1), atol=1e-6), "ragged max-pool mismatch"
    out3 = jax.block_until_ready(global_pool(x2, mode="mean"))
    assert jnp.allclose(out3, jnp.mean(x2, axis=1), atol=1e-5), "ragged mean-pool mismatch"

    # Multi-step reduction + ragged batch block (forced small per-buffer budget
    # so the grid has several reduction steps even at small shapes).
    x3 = jax.random.normal(jax.random.PRNGKey(2), (10, 100, 128), dtype=jnp.float32)
    small = 64 * 1024
    out4 = jax.block_until_ready(global_pool(x3, mode="max", _per_buffer_bytes=small))
    assert jnp.allclose(out4, jnp.max(x3, axis=1), atol=1e-6), "multi-step max mismatch"
    out5 = jax.block_until_ready(global_pool(x3, mode="mean", _per_buffer_bytes=small))
    assert jnp.allclose(out5, jnp.mean(x3, axis=1), atol=1e-5), "multi-step mean mismatch"

    print("KERNEL_OK")
</pallas_src>

<mosaic_0001>
module attributes {stable_mosaic.version = 11 : i64} {
  func.func @_pool_kernel(%arg0: i32, %arg1: i32, %arg2: i32, %arg3: memref<2x16x128xf32, #tpu.memory_space<vmem>>, %arg4: memref<2x128xf32, #tpu.memory_space<vmem>>, %arg5: memref<2x8x128xf32, #tpu.memory_space<vmem>>) attributes {dimension_semantics = [#tpu.dimension_semantics<parallel>, #tpu.dimension_semantics<parallel>, #tpu.dimension_semantics<arbitrary>], iteration_bounds = array<i64: 1, 1, 1>, scalar_prefetch = 0 : i64, scratch_operands = 1 : i64, tpu.core_type = #tpu.core_type<tc>, window_params = [{transform_indices = @transform_0, window_bounds = array<i64: 2, 16, 128>}, {transform_indices = @transform_1, window_bounds = array<i64: 2, 128>}]} {
    %c0 = arith.constant 0 : index
    %c0_0 = arith.constant 0 : index
    %c0_1 = arith.constant 0 : index
    %0 = vector.load %arg3[%c0, %c0_0, %c0_1] : memref<2x16x128xf32, #tpu.memory_space<vmem>>, vector<2x16x128xf32>
    %1 = vector.shape_cast %0 : vector<2x16x128xf32> to vector<2x2x8x128xf32>
    %cst = arith.constant dense<0xFF800000> : vector<2x8x128xf32>
    %2 = vector.multi_reduction <maximumf>, %1, %cst [1] : vector<2x2x8x128xf32> to vector<2x8x128xf32>
    %c0_i32 = arith.constant 0 : i32
    %3 = arith.cmpi eq, %arg2, %c0_i32 : i32
    %4 = arith.extui %3 : i1 to i32
    %c0_i32_2 = arith.constant 0 : i32
    %5 = arith.cmpi ne, %4, %c0_i32_2 : i32
    scf.if %5 {
      %c0_7 = arith.constant 0 : index
      %c0_8 = arith.constant 0 : index
      %c0_9 = arith.constant 0 : index
      %12 = vector.load %arg5[%c0_7, %c0_8, %c0_9] : memref<2x8x128xf32, #tpu.memory_space<vmem>>, vector<2x8x128xf32>
      tpu.vector_store %arg5[%c0_7, %c0_8, %c0_9], %2 {strides = array<i32>} : memref<2x8x128xf32, #tpu.memory_space<vmem>>, vector<2x8x128xf32>,
    } else {
    }
    %c0_i32_3 = arith.constant 0 : i32
    %6 = arith.cmpi sgt, %arg2, %c0_i32_3 : i32
    %7 = arith.extui %6 : i1 to i32
    %c0_i32_4 = arith.constant 0 : i32
    %8 = arith.cmpi ne, %7, %c0_i32_4 : i32
    scf.if %8 {
      %c0_7 = arith.constant 0 : index
      %c0_8 = arith.constant 0 : index
      %c0_9 = arith.constant 0 : index
      %12 = vector.load %arg5[%c0_7, %c0_8, %c0_9] : memref<2x8x128xf32, #tpu.memory_space<vmem>>, vector<2x8x128xf32>
      %13 = arith.maximumf %12, %2 : vector<2x8x128xf32>
      %c0_10 = arith.constant 0 : index
      %c0_11 = arith.constant 0 : index
      %c0_12 = arith.constant 0 : index
      %14 = vector.load %arg5[%c0_10, %c0_11, %c0_12] : memref<2x8x128xf32, #tpu.memory_space<vmem>>, vector<2x8x128xf32>
      tpu.vector_store %arg5[%c0_10, %c0_11, %c0_12], %13 {strides = array<i32>} : memref<2x8x128xf32, #tpu.memory_space<vmem>>, vector<2x8x128xf32>,
    } else {
    }
    %c0_i32_5 = arith.constant 0 : i32
    %9 = arith.cmpi eq, %arg2, %c0_i32_5 : i32
    %10 = arith.extui %9 : i1 to i32
    %c0_i32_6 = arith.constant 0 : i32
    %11 = arith.cmpi ne, %10, %c0_i32_6 : i32
    scf.if %11 {
      %c0_7 = arith.constant 0 : index
      %c0_8 = arith.constant 0 : index
      %c0_9 = arith.constant 0 : index
      %12 = vector.load %arg5[%c0_7, %c0_8, %c0_9] : memref<2x8x128xf32, #tpu.memory_space<vmem>>, vector<2x8x128xf32>
      %cst_10 = arith.constant dense<0xFF800000> : vector<2x128xf32>
      %13 = vector.multi_reduction <maximumf>, %12, %cst_10 [1] : vector<2x8x128xf32> to vector<2x128xf32>
      %c0_11 = arith.constant 0 : index
      %c0_12 = arith.constant 0 : index
      %14 = vector.load %arg4[%c0_11, %c0_12] : memref<2x128xf32, #tpu.memory_space<vmem>>, vector<2x128xf32>
      tpu.vector_store %arg4[%c0_11, %c0_12], %13 {strides = array<i32>} : memref<2x128xf32, #tpu.memory_space<vmem>>, vector<2x128xf32>,
    } else {
    }
    return
  }
  func.func @transform_0(%arg0: i32, %arg1: i32, %arg2: i32) -> (i32, i32, i32) {
    %c0_i32 = arith.constant 0 : i32
    return %arg0, %arg2, %arg1 : i32, i32, i32
  }
  func.func @transform_1(%arg0: i32, %arg1: i32, %arg2: i32) -> (i32, i32) {
    %c0_i32 = arith.constant 0 : i32
    return %arg0, %arg1 : i32, i32
  }
}

</mosaic_0001>

<bundles_post_ra>
// kernel: tpu_custom_call.1
= control target key start
LH: loop header
LB: loop body
LE: loop exit
PB: predicated region body
PF: predicated region fallthrough
CT: control target
= control target key end

     0   :  { %6 = vsyncpa [#allocation4], 0  ;;  %s163_s0 = inlined_call_operand.hbm [shape: f32[2,16,128], index: 0, kind: input, shape index: {}]   ;;  %s164_s1 = inlined_call_operand.hbm [shape: f32[2,128], index: 1, kind: output, shape index: {}]  }
   0x1   :  { %7 = vsyncpa [#allocation5], 0  ;;  %s12_s8 = sshll.u32 %s163_s0, 4  ;;  %s143_s9 = smov [#allocation3]   ;;  %s13_s8 = int_to_ptr.hbm [resolvable:$true] %s12_s8 }
   0x2   :  { %s14_s10 = sshll.u32 %s143_s9, 4  ;;  %s144_s11 = smov 128   ;;  %s15_s10 = int_to_ptr.vmem [resolvable:$true] %s14_s10 }
   0x3   :  { %s145_s12 = smov 8  }
   0x4   :  { %20 = dma.hbm_to_vmem [thread:$0]  %s13_s8, 512, %s15_s10, [#allocation4], %s144_s11, %s144_s11, %s145_s12  }
   0x5   :  { %139 = dma.done.wait [#allocation4], 512  }
   0x6   :  { %140 = vsyncadd [#allocation4], 4294966784  ;;  %v25_v0 = vld [vmem:[#allocation3] sm:$0xff]  ;;  %v26_v1 = vld [vmem:[#allocation3 + $0x8] sm:$0xff]  ;;  %s146_s0 = smov [#allocation6]   ;;  %s77_s16 = sshll.u32 %s164_s1, 4  ;;  %s78_s16 = int_to_ptr.hbm [resolvable:$true] %s77_s16 }
   0x7   :  { %v27_v2 = vld [vmem:[#allocation3 + $0x10] sm:$0xff]  ;;  %v28_v3 = vld [vmem:[#allocation3 + $0x18] sm:$0xff]  ;;  %v29_v4 = vmax.f32 %v25_v0, %v26_v1  ;;  %s75_s13 = sshll.u32 %s146_s0, 4  ;;  %vm66_vm0 = vcmask 1041409   ;;  %s76_s13 = int_to_ptr.vmem [resolvable:$true] %s75_s13 }
   0x8   :  { %v30_v5 = vmax.f32 %v27_v2, %v28_v3 }
   0x9   :  { %v52_v6 = vrot.slane %v29_v4, 4 }
   0xa   :  { %v58_v7 = vrot.slane %v30_v5, 4 }
   0xb   :  { %v53_v8 = vmax.f32 %v29_v4, %v52_v6 }
   0xc   :  { %v59_v9 = vmax.f32 %v30_v5, %v58_v7 }
   0xd   :  { %v54_v10 = vrot.slane %v53_v8, 2 }
   0xe   :  { %v60_v11 = vrot.slane %v59_v9, 2 }
   0xf   :  { %v55_v12 = vmax.f32 %v53_v8, %v54_v10 }
  0x10   :  { %v61_v13 = vmax.f32 %v59_v9, %v60_v11 }
  0x11   :  { %v56_v14 = vrot.slane %v55_v12, 1 }
  0x12   :  { %v62_v15 = vrot.slane %v61_v13, 1 }
  0x13   :  { %v57_v16 = vmax.f32 %v55_v12, %v56_v14 }
  0x14   :  { %v63_v17 = vmax.f32 %v61_v13, %v62_v15 }
  0x16   :  { %v67_v18 = vsel %vm66_vm0, %v63_v17, %v57_v16 }
  0x17   :  { %69 = vst [vmem:[#allocation6] sm:$0x3] %v67_v18 }
  0x18   :  { %80 = dma.vmem_to_hbm [thread:$0]  %s76_s13, 32, %s78_s16, [#allocation5]  }
  0x19   :  { %141 = dma.done.wait [#allocation5], 32  }
  0x1a   :  { %142 = vsyncadd [#allocation5], 4294967264 }
  0x1b   :  { %85 = vsyncpa [#allocation4], 1 }
  0x1c   :  { %86 = vsyncpa [#allocation5], 1 }

</bundles_post_ra>
